<compile_context>
chip_gen: v5e
topology: v5e:2x2
jax: 0.10.0
libtpu: 0.0.40
codegen_flags: <defaults>
</compile_context>

<pallas_src>
import functools

import jax
import jax.numpy as jnp
from jax.experimental import pallas as pl
from jax.experimental.pallas import tpu as pltpu


# ----------------------------------------------------------------------------------------------
# Fused single-pass kernel (common case: one batch element's (C, HW) plane fits in VMEM budget)
# ----------------------------------------------------------------------------------------------
def _eca_attention_kernel(w_ref, x_ref, o_ref, *, inv_hw):
    """Fused ECA attention for a block of NB batch elements.

    w_ref : SMEM f32[3]        conv1d taps (kernel_size=3, padding=1, no bias)
    x_ref : VMEM [NB, C, HW]   input block (flattened spatial axis on lanes)
    o_ref : VMEM [NB, C, HW]   gated output block
    """
    x = x_ref[...]                                   # input dtype (f32 or bf16)
    nb, c, _ = x.shape

    # Adaptive avg-pool to 1x1: f32-accumulated mean over the spatial lanes.
    a = jnp.sum(x, axis=-1, dtype=jnp.float32) * inv_hw          # (NB, C) f32

    # Conv1d(1, 1, k=3, padding=1, bias=False) along the channel axis, direct 3-tap form:
    # y[j] = w0*a[j-1] + w1*a[j] + w2*a[j+1], zero padding at the ends.
    w0 = w_ref[0]
    w1 = w_ref[1]
    w2 = w_ref[2]
    y = w1 * a
    if c > 1:
        zcol = jnp.zeros((nb, 1), jnp.float32)
        a_prev = jnp.concatenate([zcol, a[:, : c - 1]], axis=-1)  # a[j-1], 0 at j=0
        a_next = jnp.concatenate([a[:, 1:], zcol], axis=-1)       # a[j+1], 0 at j=C-1
        y = y + w0 * a_prev + w2 * a_next

    # Sigmoid gate (f32) then broadcast multiply in the input dtype (bf16 VALU on v6e/v7x;
    # v5e upcasts automatically).  Single store, lane-dense up to the masked tail tile.
    gate = jax.nn.sigmoid(y).astype(x.dtype)                      # (NB, C)
    o_ref[...] = x * gate[:, :, None]


# ----------------------------------------------------------------------------------------------
# Two-phase fallback kernels (planes too large for a single VMEM-resident (C, HW) block)
# ----------------------------------------------------------------------------------------------
def _row_sum_kernel(x_ref, s_ref, *, hw, ts, need_mask):
    """Accumulate f32 row sums of x2d[(N*C), HW] over spatial tiles (reduction axis = grid 1)."""
    k = pl.program_id(1)

    @pl.when(k == 0)
    def _init():
        s_ref[...] = jnp.zeros_like(s_ref)

    x = x_ref[...]                                   # (rb, ts)
    if need_mask:
        lane = jax.lax.broadcasted_iota(jnp.int32, x.shape, 1) + k * ts
        part = jnp.sum(jnp.where(lane < hw, x.astype(jnp.float32), 0.0),
                       axis=-1, keepdims=True)
    else:
        part = jnp.sum(x, axis=-1, keepdims=True, dtype=jnp.float32)
    s_ref[...] += part


def _apply_gate_kernel(g_ref, x_ref, o_ref):
    """out = x * gate, gate broadcast over the spatial lanes."""
    o_ref[...] = x_ref[...] * g_ref[...].astype(o_ref.dtype)


# ----------------------------------------------------------------------------------------------
# Wrappers
# ----------------------------------------------------------------------------------------------
def _vmem_capacity_bytes():
    try:
        cap = int(pltpu.get_tpu_info().vmem_capacity_bytes)
        if cap > 0:
            return cap
    except Exception:
        pass
    return 64 * 2**20          # safe on every TPU generation (v7x per-TC VMEM)


def _attention_fused(x_nchw, w_taps, target_block_bytes, usable_vmem, per_elem_vmem):
    n, c, h, w = x_nchw.shape
    hw = h * w
    itemsize = jnp.dtype(x_nchw.dtype).itemsize
    x = x_nchw.reshape(n, c, hw)                     # free view; spatial axis on lanes

    per_elem_bytes = c * hw * itemsize
    nb = max(1, target_block_bytes // max(per_elem_bytes, 1))    # ~8 MiB input slab per step
    nb = min(nb, max(1, usable_vmem // max(per_elem_vmem, 1)))   # fit double-buffered + temps
    nb = min(nb, n)
    nb = max(1, min(nb, -(-n // 8)))                 # keep >= ~8 grid steps (>=2) for pipelining
    grid = (-(-n // nb),)                            # cdiv; ragged last block handled by masking

    est = nb * per_elem_vmem + (2 << 20)
    vmem_limit = int(min(usable_vmem, max(est, 32 * 2**20)))

    kernel = functools.partial(_eca_attention_kernel, inv_hw=1.0 / float(hw))
    out = pl.pallas_call(
        kernel,
        out_shape=jax.ShapeDtypeStruct((n, c, hw), x.dtype),
        grid_spec=pltpu.PrefetchScalarGridSpec(
            num_scalar_prefetch=0,
            grid=grid,
            in_specs=[
                pl.BlockSpec(memory_space=pltpu.MemorySpace.SMEM),   # conv taps (3,)
                pl.BlockSpec((nb, c, hw), lambda i: (i, 0, 0)),      # x batch block
            ],
            out_specs=pl.BlockSpec((nb, c, hw), lambda i: (i, 0, 0)),
        ),
        compiler_params=pltpu.CompilerParams(
            dimension_semantics=("parallel",),
            vmem_limit_bytes=vmem_limit,
        ),
    )(w_taps, x)
    return out.reshape(n, c, h, w)


def _attention_two_phase(x_nchw, w_taps, usable_vmem, *, x_block_bytes=4 * 2**20):
    """Large-plane path: (1) tiled row-sum kernel, (2) tiny gate math in JAX, (3) apply kernel."""
    n, c, h, w = x_nchw.shape
    hw = h * w
    r = n * c
    itemsize = jnp.dtype(x_nchw.dtype).itemsize
    x2 = x_nchw.reshape(r, hw)                       # free view: rows = (n, c), lanes = spatial

    # Spatial (lane) and row (sublane) tiles obeying the (8,128) rule without padding copies.
    ts = hw if hw < 128 else min(2048, (hw // 128) * 128)
    rows_target = max(8, (x_block_bytes // max(1, ts * itemsize)) // 8 * 8)
    rb = r if r < 8 else min(rows_target, (r // 8) * 8)

    grid_r = -(-r // rb)
    grid_s = -(-hw // ts)
    vmem_limit = int(min(usable_vmem, max(32 * 2**20, 8 * rb * ts * 4)))

    # Pass 1: per-(n, c) spatial sums (reads x once).
    sums = pl.pallas_call(
        functools.partial(_row_sum_kernel, hw=hw, ts=ts, need_mask=(hw % ts) != 0),
        out_shape=jax.ShapeDtypeStruct((r, 1), jnp.float32),
        grid_spec=pltpu.PrefetchScalarGridSpec(
            num_scalar_prefetch=0,
            grid=(grid_r, grid_s),
            in_specs=[pl.BlockSpec((rb, ts), lambda i, k: (i, k))],
            out_specs=pl.BlockSpec((rb, 1), lambda i, k: (i, 0)),
        ),
        compiler_params=pltpu.CompilerParams(
            dimension_semantics=("parallel", "arbitrary"),
            vmem_limit_bytes=vmem_limit,
        ),
    )(x2)

    # Tiny (N, C) gate math in plain JAX (negligible vs streaming x through HBM).
    means = sums.reshape(n, c) * (1.0 / float(hw))
    mp = jnp.pad(means, ((0, 0), (1, 1)))
    y = w_taps[0] * mp[:, :-2] + w_taps[1] * mp[:, 1:-1] + w_taps[2] * mp[:, 2:]
    gate = jax.nn.sigmoid(y).reshape(r, 1)           # f32

    # Pass 2: apply the gate (reads x + tiny gate, writes out).
    out2 = pl.pallas_call(
        _apply_gate_kernel,
        out_shape=jax.ShapeDtypeStruct((r, hw), x2.dtype),
        grid_spec=pltpu.PrefetchScalarGridSpec(
            num_scalar_prefetch=0,
            grid=(grid_r, grid_s),
            in_specs=[pl.BlockSpec((rb, 1), lambda i, k: (i, 0)),
                      pl.BlockSpec((rb, ts), lambda i, k: (i, k))],
            out_specs=pl.BlockSpec((rb, ts), lambda i, k: (i, k)),
        ),
        compiler_params=pltpu.CompilerParams(
            dimension_semantics=("parallel", "parallel"),
            vmem_limit_bytes=vmem_limit,
        ),
    )(gate, x2)
    return out2.reshape(n, c, h, w)


def attention_layer(x_nchw, conv_weight, *, target_block_bytes=8 * 2**20, force_two_phase=False):
    """Pallas implementation of AttentionLayer.forward.

    x_nchw     : [N, C, H, W]       (float32 or bfloat16)
    conv_weight: [3] or [1, 1, 3]   the Conv1d(1, 1, 3, bias=False) weight
    returns    : [N, C, H, W]       same dtype as x
    """
    n, c, h, w = x_nchw.shape
    hw = h * w
    itemsize = jnp.dtype(x_nchw.dtype).itemsize
    w_taps = conv_weight.astype(jnp.float32).reshape(-1)         # (3,)

    usable_vmem = (_vmem_capacity_bytes() * 7) // 8              # ~56 MiB on v7x, ~112 on v5e/v6e

    # VMEM cost of one batch element in the fused path:
    #   double-buffered input + output blocks (4x itemsize) + ~2 f32-block-sized temporaries.
    per_elem_vmem = c * hw * (4 * itemsize + 8)
    if per_elem_vmem <= usable_vmem and not force_two_phase:
        return _attention_fused(x_nchw, w_taps, target_block_bytes, usable_vmem, per_elem_vmem)
    return _attention_two_phase(x_nchw, w_taps, usable_vmem)


def _reference(x_nchw, conv_weight):
    """Plain-JAX reference matching the PyTorch forward exactly."""
    wt = conv_weight.astype(jnp.float32).reshape(-1)
    a = jnp.mean(x_nchw.astype(jnp.float32), axis=(2, 3))        # (N, C)  == avg_pool(x).squeeze
    a_pad = jnp.pad(a, ((0, 0), (1, 1)))                         # zero padding=1 along channels
    y = wt[0] * a_pad[:, :-2] + wt[1] * a_pad[:, 1:-1] + wt[2] * a_pad[:, 2:]
    gate = jax.nn.sigmoid(y)[:, :, None, None]                   # (N, C, 1, 1)
    return (x_nchw.astype(jnp.float32) * gate).astype(x_nchw.dtype)


if __name__ == "__main__":
    key = jax.random.PRNGKey(0)
    kx, kw = jax.random.split(key)

    N, C, H, W = 2, 4, 16, 16
    x = jax.random.normal(kx, (N, C, H, W), dtype=jnp.float32)
    # Conv1d(1, 1, 3, bias=False) weight has shape (1, 1, 3); we keep the squeezed (3,).
    conv_weight = jax.random.normal(kw, (3,), dtype=jnp.float32) * 0.5

    ref = _reference(x, conv_weight)

    # Fused single-pass path.
    out = jax.block_until_ready(attention_layer(x, conv_weight))
    assert out.shape == x.shape and out.dtype == x.dtype
    assert jnp.allclose(out, ref, atol=1e-5, rtol=1e-5), "fused path mismatch vs reference"

    # Exercise the large-plane (two-phase) path at the same small shape.
    out2 = jax.block_until_ready(attention_layer(x, conv_weight, force_two_phase=True))
    assert jnp.allclose(out2, ref, atol=1e-5, rtol=1e-5), "two-phase path mismatch vs reference"

    print("KERNEL_OK")
</pallas_src>

<mosaic_0001>
module attributes {stable_mosaic.version = 11 : i64} {
  func.func @_eca_attention_kernel(%arg0: i32, %arg1: memref<3xf32, #tpu.memory_space<smem>>, %arg2: memref<1x4x256xf32, #tpu.memory_space<vmem>>, %arg3: memref<1x4x256xf32, #tpu.memory_space<vmem>>) attributes {dimension_semantics = [#tpu.dimension_semantics<parallel>], iteration_bounds = array<i64: 2>, scalar_prefetch = 0 : i64, scratch_operands = 0 : i64, tpu.core_type = #tpu.core_type<tc>, window_params = [{transform_indices = @transform_0, window_bounds = array<i64: 3>}, {transform_indices = @transform_1, window_bounds = array<i64: 1, 4, 256>}, {transform_indices = @transform_2, window_bounds = array<i64: 1, 4, 256>}]} {
    %c0 = arith.constant 0 : index
    %c0_0 = arith.constant 0 : index
    %c0_1 = arith.constant 0 : index
    %0 = vector.load %arg2[%c0, %c0_0, %c0_1] : memref<1x4x256xf32, #tpu.memory_space<vmem>>, vector<1x4x256xf32>
    %cst = arith.constant dense<0.000000e+00> : vector<1x4xf32>
    %1 = vector.multi_reduction <add>, %0, %cst [2] : vector<1x4x256xf32> to vector<1x4xf32>
    %cst_2 = arith.constant 3.906250e-03 : f32
    %2 = vector.broadcast %cst_2 : f32 to vector<1x4xf32>
    %3 = arith.mulf %1, %2 : vector<1x4xf32>
    %c0_3 = arith.constant 0 : index
    %4 = memref.load %arg1[%c0_3] : memref<3xf32, #tpu.memory_space<smem>>
    %c1 = arith.constant 1 : index
    %5 = memref.load %arg1[%c1] : memref<3xf32, #tpu.memory_space<smem>>
    %c2 = arith.constant 2 : index
    %6 = memref.load %arg1[%c2] : memref<3xf32, #tpu.memory_space<smem>>
    %7 = vector.broadcast %5 : f32 to vector<1x4xf32>
    %8 = arith.mulf %7, %3 : vector<1x4xf32>
    %cst_4 = arith.constant 0.000000e+00 : f32
    %9 = vector.broadcast %cst_4 : f32 to vector<1x1xf32>
    %10 = vector.extract_strided_slice %3 {offsets = [0, 0], sizes = [1, 3], strides = [1, 1]} : vector<1x4xf32> to vector<1x3xf32>
    %11 = tpu.concatenate %9, %10 in 1 : vector<1x1xf32>, vector<1x3xf32> -> vector<1x4xf32>
    %12 = vector.extract_strided_slice %3 {offsets = [0, 1], sizes = [1, 3], strides = [1, 1]} : vector<1x4xf32> to vector<1x3xf32>
    %13 = tpu.concatenate %12, %9 in 1 : vector<1x3xf32>, vector<1x1xf32> -> vector<1x4xf32>
    %14 = vector.broadcast %4 : f32 to vector<1x4xf32>
    %15 = arith.mulf %14, %11 : vector<1x4xf32>
    %16 = arith.addf %8, %15 : vector<1x4xf32>
    %17 = vector.broadcast %6 : f32 to vector<1x4xf32>
    %18 = arith.mulf %17, %13 : vector<1x4xf32>
    %19 = arith.addf %16, %18 : vector<1x4xf32>
    %20 = arith.negf %19 : vector<1x4xf32>
    %21 = math.exp %20 : vector<1x4xf32>
    %cst_5 = arith.constant 1.000000e+00 : f32
    %22 = vector.broadcast %cst_5 : f32 to vector<1x4xf32>
    %23 = arith.addf %22, %21 : vector<1x4xf32>
    %24 = arith.divf %22, %23 : vector<1x4xf32>
    %25 = vector.shape_cast %24 : vector<1x4xf32> to vector<1x4x1xf32>
    %26 = vector.broadcast %25 : vector<1x4x1xf32> to vector<1x4x256xf32>
    %27 = arith.mulf %0, %26 : vector<1x4x256xf32>
    %c0_6 = arith.constant 0 : index
    %c0_7 = arith.constant 0 : index
    %c0_8 = arith.constant 0 : index
    %28 = vector.load %arg3[%c0_6, %c0_7, %c0_8] : memref<1x4x256xf32, #tpu.memory_space<vmem>>, vector<1x4x256xf32>
    tpu.vector_store %arg3[%c0_6, %c0_7, %c0_8], %27 {strides = array<i32>} : memref<1x4x256xf32, #tpu.memory_space<vmem>>, vector<1x4x256xf32>,
    return
  }
  func.func @transform_0(%arg0: i32) -> i32 {
    %c0_i32 = arith.constant 0 : i32
    %c0_i32_0 = arith.constant 0 : i32
    return %c0_i32 : i32
  }
  func.func @transform_1(%arg0: i32) -> (i32, i32, i32) {
    %c0_i32 = arith.constant 0 : i32
    %c0_i32_0 = arith.constant 0 : i32
    %c0_i32_1 = arith.constant 0 : i32
    return %arg0, %c0_i32, %c0_i32_0 : i32, i32, i32
  }
  func.func @transform_2(%arg0: i32) -> (i32, i32, i32) {
    %c0_i32 = arith.constant 0 : i32
    %c0_i32_0 = arith.constant 0 : i32
    %c0_i32_1 = arith.constant 0 : i32
    return %arg0, %c0_i32, %c0_i32_0 : i32, i32, i32
  }
}

</mosaic_0001>

<bundles_post_ra>
// kernel: tpu_custom_call.1
= control target key start
LH: loop header
LB: loop body
LE: loop exit
PB: predicated region body
PF: predicated region fallthrough
CT: control target
= control target key end

     0   :  { %7 = vsyncpa [#allocation5], 0  ;;  %s730_s0 = inlined_call_operand.hbm [shape: f32[3], index: 0, kind: input, shape index: {}]   ;;  %s731_s1 = inlined_call_operand.hbm [shape: f32[2,4,256], index: 1, kind: input, shape index: {}]   ;;  %s732_s2 = inlined_call_operand.hbm [shape: f32[2,4,256], index: 2, kind: output, shape index: {}]  }
   0x1   :  { %8 = vsyncpa [#allocation3], 0 }
   0x2   :  { %10 = vsyncpa [#allocation3 + $0x1], 0 }
   0x3   :  { %11 = vsyncpa [#allocation4], 0 }
   0x4   :  { %13 = vsyncpa [#allocation4 + $0x1], 0  ;;  %s584_s9 = smov 0   ;;  %s586_s10 = smov 0  }
   0x5   :  { %s588_s11 = smov 0   ;;  %s590_s12 = smov 0  }
   0x6 LB: > { %s605_s13 = sadd.s32 4294967295, %s564_s12   ;;  %s361_s14 = sadd.s32 4294967294, %s564_s12   ;;  %s564_s12 = sphi %s590_s12, %s742_s12   ;;  %s560_s11 = sphi %s588_s11, %s741_s11   ;;  %s556_s10 = sphi %s586_s10, %s740_s10   ;;  %s552_s9 = sphi %s584_s9, %s739_s9  }
   0x7   : > { %p60_p0 = scmp.ne.s32.totalorder %s556_s10, %s552_s9  ;;  %p61_p1 = scmp.eq.s32.totalorder %s605_s13, 0 }
   0x8   : > { %p84_p2 = scmp.eq.s32.totalorder %s605_s13, 1  ;;  %p90_p3 = scmp.eq.s32.totalorder %s361_s14, 1 }
   0x9   : > { %p614_p4 = por %p61_p1, %p60_p0  ;;  %p362_p5 = scmp.ge.s32.totalorder %s564_s12, 1 }
   0xa   : > { %p619_p6 = por %p90_p3, %p60_p0  ;;  %p97_p7 = scmp.lt.s32.totalorder %s564_s12, 3 }
   0xb   : > { %s109_s19 = sshll.u32 %s730_s0, 4  ;;  %s635_s21 = sadd.s32 1, %s564_s12   ;;  %s110_s19 = int_to_ptr.hbm [resolvable:$true] %s109_s19 }
   0xc   : > { %p627_p8 = pnand %p362_p5, %p97_p7  ;;  %s44_s22 = ssub.s32 %s564_s12, %s635_s21 }
   0xd   : > { %p45_p12 = scmp.eq.s32.totalorder %s44_s22, 0  ;;  %s47_s23 = sadd.s32 1, %s560_s11 }
   0xe   : > { %p390_p10 = pneg %p627_p8  ;;  %p54_p13 = scmp.ne.s32.totalorder %s560_s11, %s556_s10 }
   0xf   : > { %s566_s24 = smov [#allocation2]   ;;  %p55_p0 = scmp.eq.s32.totalorder %s564_s12, 0 }
  0x10   : > { %p391_p11 = pnand %p390_p10, %p61_p1  ;;  %p650_p3 = por %p84_p2, %p54_p13 }
  0x11   : > { %s645_s25 = scalar_select %p45_p12, %s560_s11, %s47_s23  }
  0x12   : > { %393 = dma.hbm_to_smem (!%p391_p11), %s110_s19, 16, %s566_s24, [#allocation5]  }
  0x13   : > { %s120_s27 = sand.u32 1, %s560_s11   ;;  %p56_p5 = por %p55_p0, %p54_p13 }
  0x14   : > { %p403_p7 = scmp.lt.s32.totalorder %s564_s12, 2  ;;  %s365_s28 = sshll.u32 %s120_s27, 3 }
  0x15   : > { %s380_s29 = sshll.u32 %s564_s12, 3  ;;  %s124_s6 = scalar_lea.vmem [#allocation6], %s365_s28 }
  0x16   : > { %s129_s4 = scalar_lea.hbm %s731_s1, %s380_s29  ;;  %s133_s7 = sshll.u32 %s124_s6, 4  ;;  %s134_s7 = int_to_ptr.vmem [resolvable:$true] %s133_s7 }
  0x17   : > { %s131_s5 = sshll.u32 %s129_s4, 4  ;;  %p660_p10 = pnand %p403_p7, %p56_p5  ;;  %s132_s5 = int_to_ptr.hbm [resolvable:$true] %s131_s5 }
  0x18   : > { %s121_s14 = scalar_lea.sflag [#allocation3], %s120_s27  ;;  %s464_s17 = sshra.s32 %s132_s5, 4  ;;  %s465_s17 = int_to_ptr.hbm [resolvable:$true] %s464_s17 }
  0x19   : > { %s466_s18 = scalar_lea.hbm %s465_s17, 8  ;;  %p468_p11 = pneg %p660_p10 }
  0x1a   : > { %p467_p2 = scmp.ne.s32.totalorder %s465_s17, %s466_s18  ;;  %s471_s23 = scalar_lea.hbm %s731_s1, 16 }
  0x1b   : > { %p472_p0 = scmp.lt.s32.totalorder %s465_s17, %s731_s1  ;;  %p473_p5 = scmp.lt.s32.totalorder %s471_s23, %s466_s18 }
  0x1c   : > { %p469_p12 = pnand %p468_p11, %p467_p2 }
  0x1d   : > { %p474_p7 = por %p473_p5, %p472_p0 }
  0x1e   : > { %p470_p13 = pneg %p469_p12 }
  0x20   : > { %p475_p9 = pnand %p474_p7, %p470_p13 }
  0x22   : > { %478 = shalt.err (!%p475_p9)
}
  0x23   : > { %397 = dma.hbm_to_vmem [thread:$0]  (!%p660_p10), %s132_s5, 128, %s134_s7, %s121_s14  }
  0x24   : > { %142 = sbr.rel (%p627_p8) target bundleno = 454 (0x1c6), region = 28 }
  0x29   : > { %539 = dma.done.wait (%p61_p1), [#allocation5], 16  }
  0x2a   : > { %541 = vsyncadd (%p61_p1), [#allocation5], 4294967280  ;;  %s681_s27 = sand.u32 1, %s556_s10  }
  0x2b   : > { %s370_s29 = sshll.u32 %s681_s27, 3  ;;  %s150_s30 = scalar_lea.sflag [#allocation3], %s681_s27 }
  0x2c   : > { %s153_s3 = scalar_lea.vmem [#allocation6], %s370_s29 }
  0x2d   : > { %543 = dma.done.wait (%p614_p4), %s150_s30, 128  }
  0x2e   : > { %545 = vsyncadd (%p614_p4), %s150_s30, 4294967168 }
  0x2f   : > { %159 = sfence }
  0x30   : > { %v691_v0 = vld [vmem:[%s153_s3] sm:$0xff]  ;;  %vm183_vm0 = vcmask 1043456   ;;  %v196_v6 = vlaneseq  ;;  %s373_s20 = sld [smem:[#allocation2 + $0x2]]  ;;  %vm206_vm1 = vcmask 23552   ;;  %vm201_vm2 = vcmask 7168   ;;  %s381_s5 = sshll.u32 %s605_s13, 3 }
  0x31   : > { %178 = vst [vmem:[#allocation1] ss:$2 sm:$0xff] %v691_v0  ;;  %s190_s15 = sld [smem:[#allocation2]]  ;;  %v567_v23 = vmov 0   ;;  %v568_v43 = vmov 839922192   ;;  %s274_s8 = scalar_lea.hbm %s732_s2, %s381_s5 }
  0x32   : > { %v213_v7 = vshrl.u32 %v196_v6, 7  ;;  %v197_v8 = vand.u32 127, %v196_v6  ;;  %s372_s4 = sld [smem:[#allocation2 + $0x1]]  ;;  %v256_v44 = vunpack.c.l.s4 %v568_v43  ;;  %s175_s14 = scalar_lea.vmem [#allocation7], %s370_s29 }
  0x33   : > { %s276_s17 = sshll.u32 %s175_s14, 4  ;;  %s278_s18 = sshll.u32 %s274_s8, 4  ;;  %s277_s17 = int_to_ptr.vmem [resolvable:$true] %s276_s17  ;;  %s279_s18 = int_to_ptr.hbm [resolvable:$true] %s278_s18 }
  0x34   : > { %442 = vset.pattern.permute.xlu1 %v213_v7  ;;  %441 = vset.pattern.permute.xlu0 %v213_v7  ;;  %v198_v9 = vadd.s32 4294967295, %v197_v8  ;;  %v203_v10 = vadd.s32 1, %v197_v8  ;;  %v257_v45 = vunpack.c.0.s8 %v256_v44  ;;  %s263_s19 = scalar_lea.sflag [#allocation4], %s681_s27  ;;  %s508_s22 = sshra.s32 %s279_s18, 4  ;;  %s509_s22 = int_to_ptr.hbm [resolvable:$true] %s508_s22 }
  0x35   : > { %s510_s13 = scalar_lea.hbm %s509_s22, 8  ;;  %s514_s28 = scalar_lea.hbm %s732_s2, 16 }
  0x36   : > { %v220_v14 = vstv %s373_s20  ;;  %p511_p1 = scmp.ne.s32.totalorder %s509_s22, %s510_s13  ;;  %p515_p9 = scmp.lt.s32.totalorder %s509_s22, %s732_s2 }
  0x37   : > { %v208_v16 = vstv %s190_s15  ;;  %p516_p10 = scmp.lt.s32.totalorder %s514_s28, %s510_s13 }
  0x38   : > { %v179_v1 = vld.sshfl [vmem:[#allocation1] sm:$0xff pattern:$0x75316420]  ;;  %v180_v2 = vld.sshfl [vmem:[#allocation1 + $0x8] sm:$0xff pattern:$0x75316420]  ;;  %v193_v24 = vstv %s372_s4  ;;  %p512_p4 = pnand %p511_p1, %p650_p3 }
  0x39   : > { %v184_v3 = vsel %vm183_vm0, %v179_v1, 0.0  ;;  %v185_v4 = vsel %vm183_vm0, %v180_v2, 0.0  ;;  %p517_p2 = por %p516_p10, %p515_p9 }
  0x3a   : > { %v186_v5 = vadd.f32 %v185_v4, %v184_v3  ;;  %p513_p8 = pneg %p512_p4 }
  0x3c   : > { %187 = vadd.xlane.f32.xlu0 %v186_v5  ;;  %p518_p11 = pnand %p517_p2, %p513_p8 }
  0xaf   : > { %v188_v11 = vpop.xlane.xlu0 %187 }
  0xb0   : > { %v189_v12 = vmul.f32 0.00390625, %v188_v11 }
  0xb2   : > { %v204_v13 = vperm.slane %v189_v12, %v203_v10  ;;  %v199_v15 = vperm.slane %v189_v12, %v198_v9  ;;  %v194_v25 = vmul.f32 %v193_v24, %v189_v12 }
  0xb4   : > { %v207_v17 = vsel %vm206_vm1, %v204_v13, 0.0  ;;  %v202_v18 = vsel %vm201_vm2, 0.0, %v199_v15 }
  0xb5   : > { %v221_v19 = vmul.f32 %v220_v14, %v207_v17  ;;  %v209_v20 = vmul.f32 %v208_v16, %v202_v18 }
  0xb7   : > { %v223_v21 = vperm.slane %v221_v19, 1  ;;  %v211_v22 = vperm.slane %v209_v20, 0 }
  0xb9   : > { %228 = vperm.xlu1 %442, %v223_v21   ;;  %216 = vperm.xlu0 %441, %v211_v22  }
  0xc1   : > { %443 = vset.pattern.permute.xlu1 %v567_v23  ;;  %444 = vset.pattern.permute.xlu0 %v567_v23 }
 0x12b   : > { %v217_v26 = vpop.permute.xlu0 %216  ;;  %v229_v28 = vpop.permute.xlu1 %228 }
 0x12c   : > { %v219_v27 = vadd.f32 %v217_v26, %v194_v25 }
 0x12e   : > { %v231_v29 = vadd.f32 %v229_v28, %v219_v27 }
 0x130   : > { %v374_v30 = vmul.f32 -1.442695, %v231_v29 }
 0x132   : > { %445 = vpow2.f32 %v374_v30 }
 0x138   : > { %v446_v31 = vpop.eup %445 }
 0x139   : > { %v235_v32 = vadd.f32 1.0, %v446_v31 }
 0x13b   : > { %447 = vrcp.f32 %v235_v32  ;;  %v247_v36 = vand.u32 2147483648, %v235_v32  ;;  %v245_v38 = vand.u32 2147483647, %v235_v32  ;;  %vm241_vm4 = vweird.f32 %v235_v32 }
 0x13d   : > { %v248_v40 = vor.u32 1.1754944e-38, %v247_v36  ;;  %vm246_vm6 = vcmp.eq.f32.partialorder %v245_v38, 8.507059e+37 }
 0x141   : > { %v448_v33 = vpop.eup %447 }
 0x142   : > { %v237_v34 = vmul.f32 %v448_v33, %v235_v32  ;;  %vm242_vm3 = vweird.f32 %v448_v33 }
 0x143   : > { %vm243_vm5 = vmor %vm241_vm4, %vm242_vm3 }
 0x144   : > { %v238_v35 = vsub.f32 1.0, %v237_v34 }
 0x146   : > { %v239_v37 = vmul.f32 %v448_v33, %v238_v35 }
 0x148   : > { %v240_v39 = vadd.f32 %v448_v33, %v239_v37 }
 0x14a   : > { %v244_v41 = vsel %vm243_vm5, %v448_v33, %v240_v39 }
 0x14b   : > { %v249_v42 = vsel %vm246_vm6, %v248_v40, %v244_v41 }
 0x14c   : > { %253 = vperm.xlu1 %443, %v249_v42  }
 0x1be   : > { %v254_v46 = vpop.permute.xlu1 %253 }
 0x1bf   : > { %v258_v47 = vperm.slane %v254_v46, %v257_v45 }
 0x1c1   : > { %v260_v48 = vmul.f32 %v258_v47, %v691_v0 }
 0x1c3   : > { %261 = vst [vmem:[%s175_s14] sm:$0xff] %v260_v48 }
 0x1c4   : > { %521 = shalt.err (!%p518_p11)
}
 0x1c5   : > { %388 = dma.vmem_to_hbm [thread:$0]  (%p650_p3), %s277_s17, 128, %s279_s18, %s263_s19  }
 0x1c6 PF: > { %s290_s27 = sand.u32 1, %s552_s9   ;;  %p738_p12 = scmp.ge.s32.totalorder %s564_s12, 2 }
 0x1c7   : > { %s291_s3 = scalar_lea.sflag [#allocation4], %s290_s27 }
 0x1c8   : > { %p399_p13 = pnand %p738_p12, %p619_p6 }
 0x1ca   : > { %p400_p0 = pneg %p399_p13 }
 0x1cc   : > { %547 = dma.done.wait (%p400_p0), %s291_s3, 128  }
 0x1cd   : > { %549 = vsyncadd (%p400_p0), %s291_s3, 4294967168  ;;  %p16_p5 = scmp.ge.s32.totalorder %s635_s21, 4   ;;  %s739_s9 = smov %s556_s10 }
 0x1ce   : > { %s740_s10 = smov %s560_s11  ;;  %s741_s11 = smov %s645_s25 }
 0x1cf   : > { %s742_s12 = smov %s635_s21  ;;  %18 = sbr.rel (!%p16_p5) target bundleno = 6 (0x6), region = 78 }
 0x1d4   :  { %297 = vsyncpa [#allocation3], 1 }
 0x1d5   :  { %299 = vsyncpa [#allocation3 + $0x1], 1 }
 0x1d6   :  { %300 = vsyncpa [#allocation4], 1 }
 0x1d7   :  { %302 = vsyncpa [#allocation4 + $0x1], 1 }
 0x1d8   :  { %303 = vsyncpa [#allocation5], 1 }
 0x1d9   :  { %305 = vsyncpa [#allocation5 + $0x1], 1 }

</bundles_post_ra>
